<compile_context>
chip_gen: v6e
topology: v6e:2x2x1
jax: 0.10.0
libtpu: 0.0.40
codegen_flags: <defaults>
</compile_context>

<pallas_src>
import functools
import math

import jax
import jax.numpy as jnp
from jax.experimental import pallas as pl
from jax.experimental.pallas import tpu as pltpu


# ----------------------------------------------------------------------------
# Tile selection: aligned divisor of `dim` that is <= preferred, else full dim.
# ----------------------------------------------------------------------------
def _pick_tile(dim, preferred, align):
    if dim <= preferred:
        return dim
    t = preferred
    while t >= align:
        if dim % t == 0:
            return t
        t //= 2
    return dim  # full-extent block is always legal w.r.t. the (8,128) rule


# ----------------------------------------------------------------------------
# Tiled linear (x @ W + b [+ residual]) kernels
# ----------------------------------------------------------------------------
def _linear_kernel(x_ref, w_ref, b_ref, o_ref, acc_ref):
    k = pl.program_id(2)

    @pl.when(k == 0)
    def _():
        acc_ref[...] = jnp.zeros_like(acc_ref)

    acc_ref[...] += jnp.dot(
        x_ref[...], w_ref[...], preferred_element_type=jnp.float32
    )

    @pl.when(k == pl.num_programs(2) - 1)
    def _():
        o_ref[...] = (acc_ref[...] + b_ref[...].astype(jnp.float32)).astype(o_ref.dtype)


def _linear_residual_kernel(x_ref, w_ref, b_ref, r_ref, o_ref, acc_ref):
    k = pl.program_id(2)

    @pl.when(k == 0)
    def _():
        acc_ref[...] = jnp.zeros_like(acc_ref)

    acc_ref[...] += jnp.dot(
        x_ref[...], w_ref[...], preferred_element_type=jnp.float32
    )

    @pl.when(k == pl.num_programs(2) - 1)
    def _():
        o_ref[...] = (
            acc_ref[...]
            + b_ref[...].astype(jnp.float32)
            + r_ref[...].astype(jnp.float32)
        ).astype(o_ref.dtype)


def pallas_linear(x, w, b, residual=None, *, tm=256, tn=256, tk=512):
    """x: [M, K], w: [K, N], b: [N] (optional residual: [M, N]) -> [M, N]."""
    M, K = x.shape
    Kw, N = w.shape
    assert K == Kw
    tm = _pick_tile(M, tm, 8)
    tn = _pick_tile(N, tn, 128)
    tk = _pick_tile(K, tk, 128)

    b2 = b.reshape(1, N)
    grid = (M // tm, N // tn, K // tk)

    in_specs = [
        pl.BlockSpec((tm, tk), lambda i, j, k: (i, k)),
        pl.BlockSpec((tk, tn), lambda i, j, k: (k, j)),
        pl.BlockSpec((1, tn), lambda i, j, k: (0, j)),
    ]
    if residual is None:
        kernel = _linear_kernel
        args = (x, w, b2)
    else:
        kernel = _linear_residual_kernel
        in_specs.append(pl.BlockSpec((tm, tn), lambda i, j, k: (i, j)))
        args = (x, w, b2, residual)

    return pl.pallas_call(
        kernel,
        out_shape=jax.ShapeDtypeStruct((M, N), x.dtype),
        grid=grid,
        in_specs=in_specs,
        out_specs=pl.BlockSpec((tm, tn), lambda i, j, k: (i, j)),
        scratch_shapes=[pltpu.VMEM((tm, tn), jnp.float32)],
        compiler_params=pltpu.CompilerParams(
            dimension_semantics=("parallel", "parallel", "arbitrary")
        ),
    )(*args)


# ----------------------------------------------------------------------------
# Fused scaled-dot-product attention kernel (per batch*head, per q-tile)
# ----------------------------------------------------------------------------
def _attention_kernel(q_ref, k_ref, v_ref, m_ref, attn_ref, ctx_ref, *, scale):
    # q_ref: (1, tq, dk), k_ref: (1, Sk, dk), v_ref: (1, Sk, dv), m_ref: (1, tq, Sk)
    # Pre-scale Q on the small (tq, dk) tile (cheaper than scaling the (tq, Sk) scores).
    q = q_ref[0].astype(jnp.float32) * scale             # (tq, dk)
    k = k_ref[0].astype(jnp.float32)                     # (Sk, dk)
    v = v_ref[0]                                         # (Sk, dv)

    # scores = (Q / sqrt(dk)) @ K^T  -- contract last dims, no explicit transpose
    s = jax.lax.dot_general(
        q, k, (((1,), (1,)), ((), ())), preferred_element_type=jnp.float32
    )                                                    # (tq, Sk)

    # masked_fill(mask, -1e20): mask==True (nonzero) positions are suppressed
    s = jnp.where(m_ref[0] != 0, jnp.float32(-1e20), s)

    # numerically-safe softmax in f32; normalize via one reciprocal per row
    m_row = jnp.max(s, axis=-1, keepdims=True)
    p = jnp.exp(s - m_row)
    l_row = jnp.sum(p, axis=-1, keepdims=True)
    p = p * pl.reciprocal(l_row, approx=False)

    attn_ref[0] = p.astype(attn_ref.dtype)
    ctx = jnp.dot(p.astype(v.dtype), v, preferred_element_type=jnp.float32)
    ctx_ref[0] = ctx.astype(ctx_ref.dtype)


def pallas_attention(q, k, v, mask_i32, *, num_heads, tq=256):
    """q: [B*H, Sq, dk], k: [B*H, Sk, dk], v: [B*H, Sk, dv], mask: [B, Sq, Sk] int32."""
    BH, Sq, dk = q.shape
    _, Sk, dv = v.shape
    tq = _pick_tile(Sq, tq, 8)
    scale = 1.0 / math.sqrt(dk)

    kernel = functools.partial(_attention_kernel, scale=scale)
    # Grid order: q-tile axis innermost => K/V block index is constant across the
    # inner loop, so their DMA is not reissued per q-tile.
    return pl.pallas_call(
        kernel,
        out_shape=(
            jax.ShapeDtypeStruct((BH, Sq, Sk), jnp.float32),
            jax.ShapeDtypeStruct((BH, Sq, dv), q.dtype),
        ),
        grid=(BH, Sq // tq),
        in_specs=[
            pl.BlockSpec((1, tq, dk), lambda bh, qi: (bh, qi, 0)),
            pl.BlockSpec((1, Sk, dk), lambda bh, qi: (bh, 0, 0)),
            pl.BlockSpec((1, Sk, dv), lambda bh, qi: (bh, 0, 0)),
            # mask is shared across heads: map bh -> batch index
            pl.BlockSpec((1, tq, Sk), lambda bh, qi: (bh // num_heads, qi, 0)),
        ],
        out_specs=(
            pl.BlockSpec((1, tq, Sk), lambda bh, qi: (bh, qi, 0)),
            pl.BlockSpec((1, tq, dv), lambda bh, qi: (bh, qi, 0)),
        ),
        compiler_params=pltpu.CompilerParams(
            dimension_semantics=("parallel", "parallel")
        ),
    )(q, k, v, mask_i32)


# ----------------------------------------------------------------------------
# Module forward: MultiHeadSelfAttention
# ----------------------------------------------------------------------------
def multi_head_self_attention(Q, K, V, attention_mask, params, *, num_heads, k_dim, v_dim):
    """Q/K/V: [B, S, E]; attention_mask: [B, Sq, Sk] bool (True = masked).

    Returns (output [B, Sq, E], attention [B, H, Sq, Sk]) like the torch module.
    """
    B, Sq, E = Q.shape
    Sk = K.shape[1]

    q_all = pallas_linear(Q.reshape(B * Sq, E), params["W_Q"], params["b_Q"])
    k_all = pallas_linear(K.reshape(B * Sk, E), params["W_K"], params["b_K"])
    v_all = pallas_linear(V.reshape(B * Sk, E), params["W_V"], params["b_V"])

    def split_heads(x, S, d):
        # [B*S, H*d] -> [B*H, S, d]   (layout glue; kept in XLA, see header note)
        return (
            x.reshape(B, S, num_heads, d)
            .transpose(0, 2, 1, 3)
            .reshape(B * num_heads, S, d)
        )

    q_s = split_heads(q_all, Sq, k_dim)
    k_s = split_heads(k_all, Sk, k_dim)
    v_s = split_heads(v_all, Sk, v_dim)

    attn, ctx = pallas_attention(
        q_s, k_s, v_s, attention_mask.astype(jnp.int32), num_heads=num_heads
    )

    # [B*H, Sq, dv] -> [B*Sq, H*dv]
    context = (
        ctx.reshape(B, num_heads, Sq, v_dim)
        .transpose(0, 2, 1, 3)
        .reshape(B * Sq, num_heads * v_dim)
    )

    # output projection with the residual (V) add fused into the kernel epilogue
    out = pallas_linear(
        context, params["W_fc"], params["b_fc"], residual=V.reshape(B * Sq, E)
    )
    return out.reshape(B, Sq, E), attn.reshape(B, num_heads, Sq, Sk)


# ----------------------------------------------------------------------------
# Parameter init (torch nn.Linear-style uniform; weights stored [in, out])
# ----------------------------------------------------------------------------
def init_params(key, embedding_dim, k_dim, v_dim, num_heads, dtype=jnp.float32):
    def linear_init(kw, kb, fan_in, fan_out):
        bound = 1.0 / math.sqrt(fan_in)
        w = jax.random.uniform(kw, (fan_in, fan_out), dtype, -bound, bound)
        b = jax.random.uniform(kb, (fan_out,), dtype, -bound, bound)
        return w, b

    ks = jax.random.split(key, 8)
    W_Q, b_Q = linear_init(ks[0], ks[1], embedding_dim, k_dim * num_heads)
    W_K, b_K = linear_init(ks[2], ks[3], embedding_dim, k_dim * num_heads)
    W_V, b_V = linear_init(ks[4], ks[5], embedding_dim, v_dim * num_heads)
    W_fc, b_fc = linear_init(ks[6], ks[7], v_dim * num_heads, embedding_dim)
    return dict(W_Q=W_Q, b_Q=b_Q, W_K=W_K, b_K=b_K, W_V=W_V, b_V=b_V,
                W_fc=W_fc, b_fc=b_fc)


# ----------------------------------------------------------------------------
# Pure-JAX reference (mirrors the torch module)
# ----------------------------------------------------------------------------
def reference_mhsa(Q, K, V, attention_mask, params, *, num_heads, k_dim, v_dim):
    B, Sq, E = Q.shape
    Sk = K.shape[1]
    q = (Q.reshape(B * Sq, E) @ params["W_Q"] + params["b_Q"]).reshape(
        B, Sq, num_heads, k_dim).transpose(0, 2, 1, 3)
    k = (K.reshape(B * Sk, E) @ params["W_K"] + params["b_K"]).reshape(
        B, Sk, num_heads, k_dim).transpose(0, 2, 1, 3)
    v = (V.reshape(B * Sk, E) @ params["W_V"] + params["b_V"]).reshape(
        B, Sk, num_heads, v_dim).transpose(0, 2, 1, 3)
    scores = jnp.einsum("bhqd,bhkd->bhqk", q, k) / math.sqrt(k_dim)
    scores = jnp.where(attention_mask[:, None, :, :], jnp.float32(-1e20), scores)
    attn = jax.nn.softmax(scores, axis=-1)
    ctx = jnp.einsum("bhqk,bhkd->bhqd", attn, v)
    ctx = ctx.transpose(0, 2, 1, 3).reshape(B * Sq, num_heads * v_dim)
    out = (ctx @ params["W_fc"] + params["b_fc"]).reshape(B, Sq, E) + V
    return out, attn


if __name__ == "__main__":
    B, S, E = 2, 8, 32
    H, dk, dv = 4, 8, 8

    key = jax.random.PRNGKey(0)
    kq, kk, kv, km, kp = jax.random.split(key, 5)
    Q = jax.random.normal(kq, (B, S, E), dtype=jnp.float32)
    K = jax.random.normal(kk, (B, S, E), dtype=jnp.float32)
    V = jax.random.normal(kv, (B, S, E), dtype=jnp.float32)
    attention_mask = jax.random.bernoulli(km, 0.25, (B, S, S))  # True = masked
    params = init_params(kp, E, dk, dv, H)

    out, attn = multi_head_self_attention(
        Q, K, V, attention_mask, params, num_heads=H, k_dim=dk, v_dim=dv
    )
    out, attn = jax.block_until_ready((out, attn))

    ref_out, ref_attn = reference_mhsa(
        Q, K, V, attention_mask, params, num_heads=H, k_dim=dk, v_dim=dv
    )

    assert out.shape == (B, S, E)
    assert attn.shape == (B, H, S, S)
    assert jnp.allclose(out, ref_out, atol=2e-3, rtol=2e-3), "output mismatch vs reference"
    assert jnp.allclose(attn, ref_attn, atol=2e-3, rtol=2e-3), "attention mismatch vs reference"

    print("KERNEL_OK")
</pallas_src>

<mosaic_0001>
module attributes {stable_mosaic.version = 11 : i64} {
  func.func @_linear_kernel(%arg0: i32, %arg1: i32, %arg2: i32, %arg3: memref<16x32xf32, #tpu.memory_space<vmem>>, %arg4: memref<32x32xf32, #tpu.memory_space<vmem>>, %arg5: memref<1x32xf32, #tpu.memory_space<vmem>>, %arg6: memref<16x32xf32, #tpu.memory_space<vmem>>, %arg7: memref<16x32xf32, #tpu.memory_space<vmem>>) attributes {dimension_semantics = [#tpu.dimension_semantics<parallel>, #tpu.dimension_semantics<parallel>, #tpu.dimension_semantics<arbitrary>], iteration_bounds = array<i64: 1, 1, 1>, scalar_prefetch = 0 : i64, scratch_operands = 1 : i64, tpu.core_type = #tpu.core_type<tc>, window_params = [{transform_indices = @transform_0, window_bounds = array<i64: 16, 32>}, {transform_indices = @transform_1, window_bounds = array<i64: 32, 32>}, {transform_indices = @transform_2, window_bounds = array<i64: 1, 32>}, {transform_indices = @transform_3, window_bounds = array<i64: 16, 32>}]} {
    %c0_i32 = arith.constant 0 : i32
    %0 = arith.cmpi eq, %arg2, %c0_i32 : i32
    %1 = arith.extui %0 : i1 to i32
    %c0_i32_0 = arith.constant 0 : i32
    %2 = arith.cmpi ne, %1, %c0_i32_0 : i32
    scf.if %2 {
      %cst_10 = arith.constant 0.000000e+00 : f32
      %12 = vector.broadcast %cst_10 : f32 to vector<16x32xf32>
      %c0_11 = arith.constant 0 : index
      %c0_12 = arith.constant 0 : index
      %13 = vector.load %arg7[%c0_11, %c0_12] : memref<16x32xf32, #tpu.memory_space<vmem>>, vector<16x32xf32>
      tpu.vector_store %arg7[%c0_11, %c0_12], %12 {strides = array<i32>} : memref<16x32xf32, #tpu.memory_space<vmem>>, vector<16x32xf32>,
    } else {
    }
    %c0 = arith.constant 0 : index
    %c0_1 = arith.constant 0 : index
    %3 = vector.load %arg7[%c0, %c0_1] : memref<16x32xf32, #tpu.memory_space<vmem>>, vector<16x32xf32>
    %c0_2 = arith.constant 0 : index
    %c0_3 = arith.constant 0 : index
    %4 = vector.load %arg3[%c0_2, %c0_3] : memref<16x32xf32, #tpu.memory_space<vmem>>, vector<16x32xf32>
    %c0_4 = arith.constant 0 : index
    %c0_5 = arith.constant 0 : index
    %5 = vector.load %arg4[%c0_4, %c0_5] : memref<32x32xf32, #tpu.memory_space<vmem>>, vector<32x32xf32>
    %cst = arith.constant dense<0.000000e+00> : vector<16x32xf32>
    %6 = tpu.matmul %4, %5, %cst {dimension_numbers = #tpu.dot_dimension_numbers<[1], [0], [0], [1], [0, 0, 1, 1], [], []>} : vector<16x32xf32>, vector<32x32xf32>, vector<16x32xf32> -> vector<16x32xf32>
    %7 = arith.addf %3, %6 : vector<16x32xf32>
    %c0_6 = arith.constant 0 : index
    %c0_7 = arith.constant 0 : index
    %8 = vector.load %arg7[%c0_6, %c0_7] : memref<16x32xf32, #tpu.memory_space<vmem>>, vector<16x32xf32>
    tpu.vector_store %arg7[%c0_6, %c0_7], %7 {strides = array<i32>} : memref<16x32xf32, #tpu.memory_space<vmem>>, vector<16x32xf32>,
    %c0_i32_8 = arith.constant 0 : i32
    %9 = arith.cmpi eq, %arg2, %c0_i32_8 : i32
    %10 = arith.extui %9 : i1 to i32
    %c0_i32_9 = arith.constant 0 : i32
    %11 = arith.cmpi ne, %10, %c0_i32_9 : i32
    scf.if %11 {
      %c0_10 = arith.constant 0 : index
      %c0_11 = arith.constant 0 : index
      %12 = vector.load %arg7[%c0_10, %c0_11] : memref<16x32xf32, #tpu.memory_space<vmem>>, vector<16x32xf32>
      %c0_12 = arith.constant 0 : index
      %c0_13 = arith.constant 0 : index
      %13 = vector.load %arg5[%c0_12, %c0_13] : memref<1x32xf32, #tpu.memory_space<vmem>>, vector<1x32xf32>
      %14 = vector.broadcast %13 : vector<1x32xf32> to vector<16x32xf32>
      %15 = arith.addf %12, %14 : vector<16x32xf32>
      %c0_14 = arith.constant 0 : index
      %c0_15 = arith.constant 0 : index
      %16 = vector.load %arg6[%c0_14, %c0_15] : memref<16x32xf32, #tpu.memory_space<vmem>>, vector<16x32xf32>
      tpu.vector_store %arg6[%c0_14, %c0_15], %15 {strides = array<i32>} : memref<16x32xf32, #tpu.memory_space<vmem>>, vector<16x32xf32>,
    } else {
    }
    return
  }
  func.func @transform_0(%arg0: i32, %arg1: i32, %arg2: i32) -> (i32, i32) {
    %c0_i32 = arith.constant 0 : i32
    return %arg0, %arg2 : i32, i32
  }
  func.func @transform_1(%arg0: i32, %arg1: i32, %arg2: i32) -> (i32, i32) {
    %c0_i32 = arith.constant 0 : i32
    return %arg2, %arg1 : i32, i32
  }
  func.func @transform_2(%arg0: i32, %arg1: i32, %arg2: i32) -> (i32, i32) {
    %c0_i32 = arith.constant 0 : i32
    %c0_i32_0 = arith.constant 0 : i32
    return %c0_i32, %arg1 : i32, i32
  }
  func.func @transform_3(%arg0: i32, %arg1: i32, %arg2: i32) -> (i32, i32) {
    %c0_i32 = arith.constant 0 : i32
    return %arg0, %arg1 : i32, i32
  }
}

</mosaic_0001>

<bundles_post_ra>
// kernel: tpu_custom_call.1
= control target key start
LH: loop header
LB: loop body
LE: loop exit
PB: predicated region body
PF: predicated region fallthrough
CT: control target
= control target key end

     0   :  { %8 = vsyncpa [#allocation4], 0  ;;  %s325_s0 = inlined_call_operand.hbm [shape: f32[16,32], index: 0, kind: input, shape index: {}]   ;;  %s326_s1 = inlined_call_operand.hbm [shape: f32[32,32], index: 1, kind: input, shape index: {}]   ;;  %s327_s2 = inlined_call_operand.vmem [shape: f32[1,32], index: 2, kind: input, shape index: {}]   ;;  %s328_s3 = inlined_call_operand.hbm [shape: f32[16,32], index: 3, kind: output, shape index: {}]  }
   0x1   :  { %9 = vsyncpa [#allocation7], 0 }
   0x2   :  { %10 = vsyncpa [#allocation5], 0  ;;  %s270_s12 = smov [#allocation3]  }
   0x3   :  { %s16_s13 = sshll.u32 %s270_s12, 4  ;;  %s17_s13 = int_to_ptr.vmem [resolvable:$true] %s16_s13 }
   0x4   :  { %s212_s14 = scalar_lea.vmem %s17_s13, 256  ;;  %p217_p1 = scmp.lt.s32.totalorder %s17_s13, %s17_s13 }
   0x5   :  { %p213_p0 = scmp.ne.s32.totalorder %s17_s13, %s212_s14  ;;  %p218_p2 = scmp.lt.s32.totalorder %s212_s14, %s212_s14 }
   0x7   :  { %p219_p3 = por %p218_p2, %p217_p1 }
   0x9   :  { %p220_p4 = pnand %p219_p3, %p213_p0 }
   0xb   :  { %223 = shalt.err (!%p220_p4)
}
   0xc   :  { %s271_s15 = smov 128   ;;  %s272_s16 = smov 8  }
   0xd   :  { %22 = dma.hbm_to_vmem [thread:$0]  %s325_s0, 256, %s17_s13, [#allocation4], %s271_s15, %s271_s15, %s272_s16  }
   0xe   :  { %s273_s19 = smov [#allocation6]  }
   0xf   :  { %s28_s20 = sshll.u32 %s273_s19, 4  ;;  %s29_s20 = int_to_ptr.vmem [resolvable:$true] %s28_s20 }
  0x10   :  { %s232_s21 = scalar_lea.vmem %s29_s20, 512  ;;  %p237_p6 = scmp.lt.s32.totalorder %s29_s20, %s29_s20 }
  0x11   :  { %p233_p5 = scmp.ne.s32.totalorder %s29_s20, %s232_s21  ;;  %p238_p7 = scmp.lt.s32.totalorder %s232_s21, %s232_s21 }
  0x13   :  { %p239_p8 = por %p238_p7, %p237_p6 }
  0x15   :  { %p240_p9 = pnand %p239_p8, %p233_p5 }
  0x17   :  { %243 = shalt.err (!%p240_p9)
}
  0x18   :  { %34 = dma.hbm_to_vmem [thread:$0]  %s326_s1, 512, %s29_s20, [#allocation7], %s271_s15, %s271_s15, %s272_s16  }
  0x19   :  { %264 = dma.done.wait [#allocation4], 256  }
  0x1a   :  { %265 = vsyncadd [#allocation4], 4294967040 }
  0x1b   :  { %266 = dma.done.wait [#allocation7], 512  }
  0x1c   :  { %267 = vsyncadd [#allocation7], 4294966784  ;;  %vm47_vm0 = vcmask 261120   ;;  %v274_v0 = vmov 0.0   ;;  %v57_v1 = vld [vmem:[#allocation6 + $0x18] sm:$0xff]  ;;  %v56_v2 = vld [vmem:[#allocation6 + $0x10] sm:$0xff] }
  0x1d   :  { %49 = vst.msk [vmem:[#allocation2 + $0x8] sm:$0xff] %vm47_vm0, %v274_v0  ;;  %48 = vst.msk [vmem:[#allocation2] sm:$0xff] %vm47_vm0, %v274_v0  ;;  %187 = vmatprep.subr.mxu0 %v57_v1  ;;  %v52_v3 = vld [vmem:[#allocation3] sm:$0xff]  ;;  %v55_v4 = vld [vmem:[#allocation6 + $0x8] sm:$0xff]  ;;  %s275_s24 = smov [#allocation8]  }
  0x1e   :  { %188 = vmatpush3.msra.mxu0 %v57_v1  ;;  %195 = vmatprep.mubr.msk.f32.mxu0 %vm47_vm0, %v52_v3  ;;  %v54_v5 = vld [vmem:[#allocation6] sm:$0xff]  ;;  %v53_v6 = vld [vmem:[#allocation3 + $0x8] sm:$0xff]  ;;  %s165_s25 = sshll.u32 %s275_s24, 4  ;;  %s166_s25 = int_to_ptr.vmem [resolvable:$true] %s165_s25 }
  0x1f   :  { %189 = vmatprep.subr.mxu0 %v56_v2  ;;  %v180_v13 = vld [vmem:[%s327_s2] ss:$0 sm:$0xff]  ;;  %s244_s26 = scalar_lea.vmem %s166_s25, 256  ;;  %p249_p11 = scmp.lt.s32.totalorder %s166_s25, %s166_s25 }
  0x20   :  { %190 = vmatpush3.msra.mxu0 %v56_v2  ;;  %p245_p10 = scmp.ne.s32.totalorder %s166_s25, %s244_s26  ;;  %p250_p12 = scmp.lt.s32.totalorder %s244_s26, %s244_s26 }
  0x21   :  { %191 = vmatprep.subr.mxu0 %v55_v4 }
  0x22   :  { %192 = vmatpush3.msra.mxu0 %v55_v4  ;;  %p251_p13 = por %p250_p12, %p249_p11 }
  0x23   :  { %193 = vmatprep.subr.mxu0 %v54_v5 }
  0x24   :  { %194 = vmatpush3.msra.mxu0 %v54_v5  ;;  %v51_v7 = vld [vmem:[#allocation2 + $0x8] sm:$0xff]  ;;  %v50_v9 = vld [vmem:[#allocation2] sm:$0xff]  ;;  %p252_p0 = pnand %p251_p13, %p245_p10 }
  0x25   :  { %196 = vmatmul.mubr.msk.f32.vlgmr.msra.gmra.mxu0 %vm47_vm0, %v53_v6 }
  0xe5   :  { %v197_v8 = vpop.f32.mrf.mxu0 }
  0xe6   :  { %v141_v10 = vadd.f32 %v197_v8, %v51_v7 }
  0xe7   :  { %v131_v11 = vpop.f32.mrf.mxu0 }
  0xe8   :  { %143 = vst.msk [vmem:[#allocation2 + $0x8] sm:$0xff] %vm47_vm0, %v141_v10  ;;  %v140_v12 = vadd.f32 %v131_v11, %v50_v9 }
  0xea   :  { %142 = vst.msk [vmem:[#allocation2] sm:$0xff] %vm47_vm0, %v140_v12 }
  0xef   :  { %v148_v14 = vld [vmem:[#allocation2 + $0x8] sm:$0xff] }
  0xf0   :  { %v157_v15 = vadd.f32 %v180_v13, %v148_v14 }
  0xf1   :  { %v147_v16 = vld [vmem:[#allocation2] sm:$0xff] }
  0xf2   :  { %v156_v17 = vadd.f32 %v180_v13, %v147_v16  ;;  %159 = vst.msk [vmem:[#allocation8 + $0x8] sm:$0xff] %vm47_vm0, %v157_v15 }
  0xf4   :  { %158 = vst.msk [vmem:[#allocation8] sm:$0xff] %vm47_vm0, %v156_v17 }
  0xf5   :  { %255 = shalt.err (!%p252_p0)
}
  0xf6   :  { %171 = dma.vmem_to_hbm [thread:$0]  %s166_s25, 256, %s328_s3, [#allocation5], %s271_s15, %s271_s15, %s272_s16  }
  0xf7   :  { %268 = dma.done.wait [#allocation5], 256  }
  0xf8   :  { %269 = vsyncadd [#allocation5], 4294967040 }
  0xf9   :  { %175 = vsyncpa [#allocation4], 1 }
  0xfa   :  { %176 = vsyncpa [#allocation7], 1 }
  0xfb   :  { %177 = vsyncpa [#allocation5], 1 }

</bundles_post_ra>
